<compile_context>
chip_gen: v7x
topology: tpu7x:2x2x1
jax: 0.10.0
libtpu: 0.0.40
codegen_flags: <defaults>
</compile_context>

<pallas_src>
import math
import functools

import jax
import jax.numpy as jnp
from jax import lax
from jax.experimental import pallas as pl
from jax.experimental.pallas import tpu as pltpu


def _round_up(x, m):
    return ((x + m - 1) // m) * m


def _vmem_capacity_bytes():
    try:
        return int(pltpu.get_tpu_info().vmem_capacity_bytes)
    except Exception:
        return 64 * 1024 * 1024      # v7x per-TensorCore capacity (most restrictive)


def _pipeline_vmem_bytes(tm, nr_pad, nc_pad, nfeat_pad, nhid_pad, c_pad):
    """Worst-case double-buffered VMEM footprint of either pallas_call."""
    # layer 1: x (bf16, const) + packed W1 + b1 | adj slab (i8) + scale + h tile
    l1 = (nr_pad * nfeat_pad * 2 + 2 * nfeat_pad * nhid_pad * 2 + nhid_pad * 4
          + tm * nc_pad * 1 + tm * 4 + tm * nhid_pad * 2)
    # layer 2: h (bf16, const) + packed W2 + b2 | adj slab (i8) + scale + out tile
    l2 = (nr_pad * nhid_pad * 2 + 2 * nhid_pad * c_pad * 2 + c_pad * 4
          + tm * nc_pad * 1 + tm * 4 + tm * c_pad * 4)
    return 2 * max(l1, l2)           # everything double-buffered by the pipeliner


def _choose_row_tile(n, nfeat_pad, nhid_pad, c_pad):
    """Generation-aware row-tile pick: largest of {512,256,128} whose pipeline
    footprint fits half the chip's VMEM (v6e -> 512, v7x tends to smaller)."""
    if n <= 256:
        return _round_up(n, 8)                       # single tile covers the graph
    budget = _vmem_capacity_bytes() // 2
    nc_pad = _round_up(n, 128)
    for tm in (512, 256, 128):
        nr_pad = _round_up(n, tm)
        if _pipeline_vmem_bytes(tm, nr_pad, nc_pad, nfeat_pad, nhid_pad, c_pad) <= budget:
            return tm
    return 128


# ----------------------------- kernel bodies --------------------------------

def _make_layer1_kernel(tm, nc_pad):
    """h = relu([x_tile | (adj_tile @ x) * s] @ [W1[0]; W1[1]] + b1)."""

    def kernel(x_ref, adj_ref, s_ref, w1_ref, b1_ref, h_ref):
        i = pl.program_id(0)
        row0 = pl.multiple_of(i * tm, tm)
        # Dequantize the int8 adjacency slab (per-row scale applied post-matmul).
        adj_tile = adj_ref[...].astype(jnp.float32).astype(jnp.bfloat16)  # [tm, nc_pad]
        x_c = x_ref[pl.ds(0, nc_pad), :]                                  # contraction rows
        tx1 = jnp.dot(adj_tile, x_c, preferred_element_type=jnp.float32)
        tx1 = tx1 * s_ref[...]                                            # [tm,1] row scale
        x_tile = x_ref[pl.ds(row0, tm), :]
        lhs = jnp.concatenate([x_tile, tx1.astype(jnp.bfloat16)], axis=1)
        h = jnp.dot(lhs, w1_ref[...], preferred_element_type=jnp.float32)
        h = jnp.maximum(h + b1_ref[...], 0.0)
        h_ref[...] = h.astype(h_ref.dtype)

    return kernel


def _make_layer2_kernel(tm, nc_pad, nclass, c_pad):
    """log_softmax([h_tile | (adj_tile @ h) * s] @ [W2[0]; W2[1]] + b2)."""

    def kernel(h_ref, adj_ref, s_ref, w2_ref, b2_ref, o_ref):
        i = pl.program_id(0)
        row0 = pl.multiple_of(i * tm, tm)
        adj_tile = adj_ref[...].astype(jnp.float32).astype(jnp.bfloat16)  # [tm, nc_pad]
        h_c = h_ref[pl.ds(0, nc_pad), :]
        ah = jnp.dot(adj_tile, h_c, preferred_element_type=jnp.float32)
        ah = ah * s_ref[...]
        h_tile = h_ref[pl.ds(row0, tm), :]
        lhs = jnp.concatenate([h_tile, ah.astype(jnp.bfloat16)], axis=1)
        out = jnp.dot(lhs, w2_ref[...], preferred_element_type=jnp.float32) + b2_ref[...]
        # log_softmax over the real class columns only (padded cols masked out).
        cols = lax.broadcasted_iota(jnp.int32, (tm, c_pad), 1)
        valid = cols < nclass
        masked = jnp.where(valid, out, -jnp.inf)
        m = jnp.max(masked, axis=1, keepdims=True)
        p = jnp.exp(masked - m)                       # exp(-inf) = 0 on padded cols
        lse = jnp.log(jnp.sum(p, axis=1, keepdims=True))
        o_ref[...] = jnp.where(valid, out - m - lse, 0.0).astype(o_ref.dtype)

    return kernel


# ----------------------------- host-side wrappers ----------------------------

def prepare_cheb_inputs(x, adj, w1, b1, w2, b2, *, row_tile=None):
    """One-time packing (per graph / per parameter set): pad, cast, quantize.

    Keep this OUTSIDE the hot forward so the N^2 adjacency is not re-cast /
    re-padded on every call (the kernel is HBM-bound on adj)."""
    n, nfeat = x.shape
    nhid = w1.shape[-1]
    nclass = w2.shape[-1]
    nfeat_pad = _round_up(nfeat, 128)
    nhid_pad = _round_up(nhid, 128)
    c_pad = _round_up(nclass, 128)

    tm = row_tile if row_tile is not None else _choose_row_tile(
        n, nfeat_pad, nhid_pad, c_pad)
    if n <= tm:
        tm = _round_up(n, 8)
        nr_pad = nc_pad = tm                          # single full-array tile
    else:
        tm = max(128, _round_up(tm, 128))             # multi-tile rows 128-aligned
        nr_pad = _round_up(n, tm)                     # row / grid padding
        nc_pad = _round_up(n, 128)                    # contraction-dim padding only

    f32, bf16 = jnp.float32, jnp.bfloat16

    # Adjacency: zero-pad once, symmetric per-row int8 quantization (zero-point
    # free, so padded entries stay exactly 0).  Dequantized to bf16 in-kernel,
    # never touching the integer MXU path -> safe on v5e/v6e/v7x alike, while
    # halving the dominant twice-streamed HBM read.
    adj_p = jnp.zeros((nr_pad, nc_pad), f32).at[:n, :n].set(jnp.asarray(adj, f32))
    amax = jnp.max(jnp.abs(adj_p), axis=1, keepdims=True)
    adj_scale = jnp.where(amax > 0.0, amax / 127.0, 1.0).astype(f32)   # [nr_pad, 1]
    adj_q = jnp.clip(jnp.round(adj_p / adj_scale), -127.0, 127.0).astype(jnp.int8)

    x_p = jnp.zeros((nr_pad, nfeat_pad), bf16).at[:n, :nfeat].set(
        jnp.asarray(x, bf16))

    # Chebyshev K=2 weights packed so each layer is a single MXU contraction.
    w1_p = jnp.zeros((2 * nfeat_pad, nhid_pad), bf16)
    w1_p = w1_p.at[:nfeat, :nhid].set(jnp.asarray(w1[0], bf16))
    w1_p = w1_p.at[nfeat_pad:nfeat_pad + nfeat, :nhid].set(jnp.asarray(w1[1], bf16))
    b1_p = jnp.zeros((1, nhid_pad), f32).at[0, :nhid].set(jnp.asarray(b1, f32))

    w2_p = jnp.zeros((2 * nhid_pad, c_pad), bf16)
    w2_p = w2_p.at[:nhid, :nclass].set(jnp.asarray(w2[0], bf16))
    w2_p = w2_p.at[nhid_pad:nhid_pad + nhid, :nclass].set(jnp.asarray(w2[1], bf16))
    b2_p = jnp.zeros((1, c_pad), f32).at[0, :nclass].set(jnp.asarray(b2, f32))

    operands = (x_p, adj_q, adj_scale, w1_p, b1_p, w2_p, b2_p)
    meta = dict(tm=int(tm), n=int(n), nclass=int(nclass))
    return operands, meta


@functools.partial(jax.jit, static_argnames=("tm", "n", "nclass"))
def cheb_forward_prepared(x_p, adj_q, adj_scale, w1_p, b1_p, w2_p, b2_p,
                          *, tm, n, nclass):
    """ChebModel.forward on pre-packed inputs (two Pallas calls)."""
    nr_pad, nc_pad = adj_q.shape
    nfeat_pad = x_p.shape[1]
    nhid_pad = w1_p.shape[1]
    c_pad = w2_p.shape[1]
    nr = nr_pad // tm

    need = _pipeline_vmem_bytes(tm, nr_pad, nc_pad, nfeat_pad, nhid_pad, c_pad)
    vmem_limit = int(min(_vmem_capacity_bytes(),
                         max(need + 4 * 1024 * 1024, 16 * 1024 * 1024)))
    cparams = pltpu.CompilerParams(
        dimension_semantics=("parallel",),     # row tiles shard across TensorCores
        vmem_limit_bytes=vmem_limit,
    )

    adj_spec = pl.BlockSpec((tm, nc_pad), lambda i: (i, 0))
    scale_spec = pl.BlockSpec((tm, 1), lambda i: (i, 0))

    # ---------------- layer 1: hidden activations (bf16, -> HBM) ------------
    cost1 = pl.CostEstimate(
        flops=2 * nr_pad * nc_pad * nfeat_pad + 4 * nr_pad * nfeat_pad * nhid_pad,
        transcendentals=0,
        bytes_accessed=(nr_pad * nc_pad + nr_pad * nfeat_pad * 2
                        + 4 * nfeat_pad * nhid_pad + 2 * nr_pad * nhid_pad),
    )
    h = pl.pallas_call(
        _make_layer1_kernel(tm, nc_pad),
        out_shape=jax.ShapeDtypeStruct((nr_pad, nhid_pad), jnp.bfloat16),
        grid=(nr,),
        in_specs=[
            pl.BlockSpec((nr_pad, nfeat_pad), lambda i: (0, 0)),      # x (resident)
            adj_spec,                                                 # int8 row slab
            scale_spec,                                               # per-row scale
            pl.BlockSpec((2 * nfeat_pad, nhid_pad), lambda i: (0, 0)),  # [W1[0];W1[1]]
            pl.BlockSpec((1, nhid_pad), lambda i: (0, 0)),            # b1
        ],
        out_specs=pl.BlockSpec((tm, nhid_pad), lambda i: (i, 0)),
        compiler_params=cparams,
        cost_estimate=cost1,
    )(x_p, adj_q, adj_scale, w1_p, b1_p)

    # ---------------- layer 2 + log_softmax ---------------------------------
    cost2 = pl.CostEstimate(
        flops=2 * nr_pad * nc_pad * nhid_pad + 4 * nr_pad * nhid_pad * c_pad,
        transcendentals=nr_pad * (c_pad + 1),
        bytes_accessed=(nr_pad * nc_pad + 2 * nr_pad * nhid_pad
                        + 4 * nhid_pad * c_pad + 4 * nr_pad * c_pad),
    )
    out_pad = pl.pallas_call(
        _make_layer2_kernel(tm, nc_pad, nclass, c_pad),
        out_shape=jax.ShapeDtypeStruct((nr_pad, c_pad), jnp.float32),
        grid=(nr,),
        in_specs=[
            pl.BlockSpec((nr_pad, nhid_pad), lambda i: (0, 0)),       # h (resident)
            adj_spec,
            scale_spec,
            pl.BlockSpec((2 * nhid_pad, c_pad), lambda i: (0, 0)),    # [W2[0];W2[1]]
            pl.BlockSpec((1, c_pad), lambda i: (0, 0)),               # b2
        ],
        out_specs=pl.BlockSpec((tm, c_pad), lambda i: (i, 0)),        # lane-dense store
        compiler_params=cparams,
        cost_estimate=cost2,
    )(h, adj_q, adj_scale, w2_p, b2_p)

    return out_pad[:n, :nclass]


def cheb_model_forward(x, adj, w1, b1, w2, b2, *, row_tile=None):
    """Single-shot convenience wrapper.  For repeated calls on the same graph,
    call prepare_cheb_inputs() once and reuse cheb_forward_prepared()."""
    operands, meta = prepare_cheb_inputs(x, adj, w1, b1, w2, b2, row_tile=row_tile)
    return cheb_forward_prepared(*operands, **meta)


# ----------------------------- reference & init ------------------------------

def init_cheb_params(key, in_channels, out_channels, K=2):
    """Matches ChebConv.reset_parameters: uniform(-1/sqrt(in*K), 1/sqrt(in*K))."""
    bound = 1.0 / math.sqrt(in_channels * K)
    kw, kb = jax.random.split(key)
    w = jax.random.uniform(kw, (K, in_channels, out_channels),
                           minval=-bound, maxval=bound, dtype=jnp.float32)
    b = jax.random.uniform(kb, (out_channels,),
                           minval=-bound, maxval=bound, dtype=jnp.float32)
    return w, b


def cheb_model_reference(x, adj, w1, b1, w2, b2):
    """Pure-JAX f32 reference of ChebModel.forward."""
    h = jnp.maximum(x @ w1[0] + (adj @ x) @ w1[1] + b1, 0.0)
    o = h @ w2[0] + (adj @ h) @ w2[1] + b2
    return jax.nn.log_softmax(o, axis=1)


def _make_graph(key, n, nfeat):
    kx, kadj = jax.random.split(key)
    x = jax.random.normal(kx, (n, nfeat), dtype=jnp.float32)
    a = jax.random.uniform(kadj, (n, n), dtype=jnp.float32)
    a = (a + a.T) * 0.5 + jnp.eye(n, dtype=jnp.float32)
    adj = a / jnp.sum(a, axis=1, keepdims=True)       # row-normalized adjacency
    return x, adj


if __name__ == "__main__":
    key = jax.random.PRNGKey(0)
    k_small, k_big, k1, k2, k3, k4 = jax.random.split(key, 6)

    # ---- case 1: tiny graph (single full-array tile) ------------------------
    N, NFEAT, NHID, NCLASS = 8, 16, 32, 8
    x, adj = _make_graph(k_small, N, NFEAT)
    w1, b1 = init_cheb_params(k1, NFEAT, NHID, K=2)
    w2, b2 = init_cheb_params(k2, NHID, NCLASS, K=2)

    operands, meta = prepare_cheb_inputs(x, adj, w1, b1, w2, b2)   # one-time prep
    out = jax.block_until_ready(cheb_forward_prepared(*operands, **meta))
    assert out.shape == (N, NCLASS)
    row_sums = jnp.sum(jnp.exp(out), axis=1)
    assert bool(jnp.all(jnp.abs(row_sums - 1.0) < 1e-3))
    ref = cheb_model_reference(x, adj, w1, b1, w2, b2)
    err = float(jnp.max(jnp.abs(out - ref)))
    assert err < 7.5e-2, f"small-graph max abs error vs reference too large: {err}"

    # ---- case 2: larger graph (multi row-tile, padded feature dims) ---------
    N2, NFEAT2, NHID2, NCLASS2 = 640, 100, 64, 10
    x2, adj2 = _make_graph(k_big, N2, NFEAT2)
    w1b, b1b = init_cheb_params(k3, NFEAT2, NHID2, K=2)
    w2b, b2b = init_cheb_params(k4, NHID2, NCLASS2, K=2)

    operands2, meta2 = prepare_cheb_inputs(x2, adj2, w1b, b1b, w2b, b2b)
    out2 = jax.block_until_ready(cheb_forward_prepared(*operands2, **meta2))
    assert out2.shape == (N2, NCLASS2)
    row_sums2 = jnp.sum(jnp.exp(out2), axis=1)
    assert bool(jnp.all(jnp.abs(row_sums2 - 1.0) < 1e-3))
    ref2 = cheb_model_reference(x2, adj2, w1b, b1b, w2b, b2b)
    err2 = float(jnp.max(jnp.abs(out2 - ref2)))
    assert err2 < 1.0e-1, f"large-graph max abs error vs reference too large: {err2}"

    print("KERNEL_OK")
</pallas_src>

<mosaic_0001>
module attributes {stable_mosaic.version = 11 : i64} {
  func.func @kernel(%arg0: i32, %arg1: memref<8x128xbf16, #tpu.memory_space<vmem>>, %arg2: memref<8x8xi8, #tpu.memory_space<vmem>>, %arg3: memref<8x1xf32, #tpu.memory_space<vmem>>, %arg4: memref<256x128xbf16, #tpu.memory_space<vmem>>, %arg5: memref<1x128xf32, #tpu.memory_space<vmem>>, %arg6: memref<8x128xbf16, #tpu.memory_space<vmem>>) attributes {dimension_semantics = [#tpu.dimension_semantics<parallel>], iteration_bounds = array<i64: 1>, scalar_prefetch = 0 : i64, scratch_operands = 0 : i64, tpu.core_type = #tpu.core_type<tc>, window_params = [{pipeline_mode = #tpu.pipeline_mode<synchronous>, transform_indices = @transform_0, window_bounds = array<i64: 8, 128>}, {transform_indices = @transform_1, window_bounds = array<i64: 8, 8>}, {transform_indices = @transform_2, window_bounds = array<i64: 8, 1>}, {pipeline_mode = #tpu.pipeline_mode<synchronous>, transform_indices = @transform_3, window_bounds = array<i64: 256, 128>}, {pipeline_mode = #tpu.pipeline_mode<synchronous>, transform_indices = @transform_4, window_bounds = array<i64: 1, 128>}, {transform_indices = @transform_5, window_bounds = array<i64: 8, 128>}]} {
    %c8_i32 = arith.constant 8 : i32
    %0 = arith.muli %arg0, %c8_i32 : i32
    %1 = tpu.assume_multiple %0, 8 : i32
    %c0 = arith.constant 0 : index
    %c0_0 = arith.constant 0 : index
    %2 = vector.load %arg2[%c0, %c0_0] : memref<8x8xi8, #tpu.memory_space<vmem>>, vector<8x8xi8>
    %3 = arith.sitofp %2 : vector<8x8xi8> to vector<8x8xf32>
    %4 = arith.truncf %3 : vector<8x8xf32> to vector<8x8xbf16>
    %c0_1 = arith.constant 0 : index
    %c0_2 = arith.constant 0 : index
    %5 = vector.load %arg1[%c0_1, %c0_2] : memref<8x128xbf16, #tpu.memory_space<vmem>>, vector<8x128xbf16>
    %cst = arith.constant dense<0.000000e+00> : vector<8x128xf32>
    %6 = tpu.matmul %4, %5, %cst {dimension_numbers = #tpu.dot_dimension_numbers<[1], [0], [0], [1], [0, 0, 1, 1], [], []>} : vector<8x8xbf16>, vector<8x128xbf16>, vector<8x128xf32> -> vector<8x128xf32>
    %c0_3 = arith.constant 0 : index
    %c0_4 = arith.constant 0 : index
    %7 = vector.load %arg3[%c0_3, %c0_4] : memref<8x1xf32, #tpu.memory_space<vmem>>, vector<8x1xf32>
    %8 = vector.broadcast %7 : vector<8x1xf32> to vector<8x128xf32>
    %9 = arith.mulf %6, %8 : vector<8x128xf32>
    %10 = arith.index_cast %1 : i32 to index
    %c0_5 = arith.constant 0 : index
    %11 = vector.load %arg1[%10, %c0_5] : memref<8x128xbf16, #tpu.memory_space<vmem>>, vector<8x128xbf16>
    %12 = arith.truncf %9 : vector<8x128xf32> to vector<8x128xbf16>
    %13 = tpu.concatenate %11, %12 in 1 : vector<8x128xbf16>, vector<8x128xbf16> -> vector<8x256xbf16>
    %c0_6 = arith.constant 0 : index
    %c0_7 = arith.constant 0 : index
    %14 = vector.load %arg4[%c0_6, %c0_7] : memref<256x128xbf16, #tpu.memory_space<vmem>>, vector<256x128xbf16>
    %cst_8 = arith.constant dense<0.000000e+00> : vector<8x128xf32>
    %15 = tpu.matmul %13, %14, %cst_8 {dimension_numbers = #tpu.dot_dimension_numbers<[1], [0], [0], [1], [0, 0, 1, 1], [], []>} : vector<8x256xbf16>, vector<256x128xbf16>, vector<8x128xf32> -> vector<8x128xf32>
    %c0_9 = arith.constant 0 : index
    %c0_10 = arith.constant 0 : index
    %16 = vector.load %arg5[%c0_9, %c0_10] : memref<1x128xf32, #tpu.memory_space<vmem>>, vector<1x128xf32>
    %17 = vector.broadcast %16 : vector<1x128xf32> to vector<8x128xf32>
    %18 = arith.addf %15, %17 : vector<8x128xf32>
    %cst_11 = arith.constant 0.000000e+00 : f32
    %19 = vector.broadcast %cst_11 : f32 to vector<8x128xf32>
    %20 = arith.maximumf %18, %19 : vector<8x128xf32>
    %21 = arith.truncf %20 : vector<8x128xf32> to vector<8x128xbf16>
    %c0_12 = arith.constant 0 : index
    %c0_13 = arith.constant 0 : index
    %22 = vector.load %arg6[%c0_12, %c0_13] : memref<8x128xbf16, #tpu.memory_space<vmem>>, vector<8x128xbf16>
    tpu.vector_store %arg6[%c0_12, %c0_13], %21 {strides = array<i32>} : memref<8x128xbf16, #tpu.memory_space<vmem>>, vector<8x128xbf16>,
    return
  }
  func.func @transform_0(%arg0: i32) -> (i32, i32) {
    %c0_i32 = arith.constant 0 : i32
    %c0_i32_0 = arith.constant 0 : i32
    %c0_i32_1 = arith.constant 0 : i32
    return %c0_i32, %c0_i32_0 : i32, i32
  }
  func.func @transform_1(%arg0: i32) -> (i32, i32) {
    %c0_i32 = arith.constant 0 : i32
    %c0_i32_0 = arith.constant 0 : i32
    return %arg0, %c0_i32 : i32, i32
  }
  func.func @transform_2(%arg0: i32) -> (i32, i32) {
    %c0_i32 = arith.constant 0 : i32
    %c0_i32_0 = arith.constant 0 : i32
    return %arg0, %c0_i32 : i32, i32
  }
  func.func @transform_3(%arg0: i32) -> (i32, i32) {
    %c0_i32 = arith.constant 0 : i32
    %c0_i32_0 = arith.constant 0 : i32
    %c0_i32_1 = arith.constant 0 : i32
    return %c0_i32, %c0_i32_0 : i32, i32
  }
  func.func @transform_4(%arg0: i32) -> (i32, i32) {
    %c0_i32 = arith.constant 0 : i32
    %c0_i32_0 = arith.constant 0 : i32
    %c0_i32_1 = arith.constant 0 : i32
    return %c0_i32, %c0_i32_0 : i32, i32
  }
  func.func @transform_5(%arg0: i32) -> (i32, i32) {
    %c0_i32 = arith.constant 0 : i32
    %c0_i32_0 = arith.constant 0 : i32
    return %arg0, %c0_i32 : i32, i32
  }
}

module attributes {stable_mosaic.version = 11 : i64} {
  func.func @kernel(%arg0: i32, %arg1: memref<8x128xbf16, #tpu.memory_space<vmem>>, %arg2: memref<8x8xi8, #tpu.memory_space<vmem>>, %arg3: memref<8x1xf32, #tpu.memory_space<vmem>>, %arg4: memref<256x128xbf16, #tpu.memory_space<vmem>>, %arg5: memref<1x128xf32, #tpu.memory_space<vmem>>, %arg6: memref<8x128xf32, #tpu.memory_space<vmem>>) attributes {dimension_semantics = [#tpu.dimension_semantics<parallel>], iteration_bounds = array<i64: 1>, scalar_prefetch = 0 : i64, scratch_operands = 0 : i64, tpu.core_type = #tpu.core_type<tc>, window_params = [{pipeline_mode = #tpu.pipeline_mode<synchronous>, transform_indices = @transform_0, window_bounds = array<i64: 8, 128>}, {transform_indices = @transform_1, window_bounds = array<i64: 8, 8>}, {transform_indices = @transform_2, window_bounds = array<i64: 8, 1>}, {pipeline_mode = #tpu.pipeline_mode<synchronous>, transform_indices = @transform_3, window_bounds = array<i64: 256, 128>}, {pipeline_mode = #tpu.pipeline_mode<synchronous>, transform_indices = @transform_4, window_bounds = array<i64: 1, 128>}, {transform_indices = @transform_5, window_bounds = array<i64: 8, 128>}]} {
    %c8_i32 = arith.constant 8 : i32
    %0 = arith.muli %arg0, %c8_i32 : i32
    %1 = tpu.assume_multiple %0, 8 : i32
    %c0 = arith.constant 0 : index
    %c0_0 = arith.constant 0 : index
    %2 = vector.load %arg2[%c0, %c0_0] : memref<8x8xi8, #tpu.memory_space<vmem>>, vector<8x8xi8>
    %3 = arith.sitofp %2 : vector<8x8xi8> to vector<8x8xf32>
    %4 = arith.truncf %3 : vector<8x8xf32> to vector<8x8xbf16>
    %c0_1 = arith.constant 0 : index
    %c0_2 = arith.constant 0 : index
    %5 = vector.load %arg1[%c0_1, %c0_2] : memref<8x128xbf16, #tpu.memory_space<vmem>>, vector<8x128xbf16>
    %cst = arith.constant dense<0.000000e+00> : vector<8x128xf32>
    %6 = tpu.matmul %4, %5, %cst {dimension_numbers = #tpu.dot_dimension_numbers<[1], [0], [0], [1], [0, 0, 1, 1], [], []>} : vector<8x8xbf16>, vector<8x128xbf16>, vector<8x128xf32> -> vector<8x128xf32>
    %c0_3 = arith.constant 0 : index
    %c0_4 = arith.constant 0 : index
    %7 = vector.load %arg3[%c0_3, %c0_4] : memref<8x1xf32, #tpu.memory_space<vmem>>, vector<8x1xf32>
    %8 = vector.broadcast %7 : vector<8x1xf32> to vector<8x128xf32>
    %9 = arith.mulf %6, %8 : vector<8x128xf32>
    %10 = arith.index_cast %1 : i32 to index
    %c0_5 = arith.constant 0 : index
    %11 = vector.load %arg1[%10, %c0_5] : memref<8x128xbf16, #tpu.memory_space<vmem>>, vector<8x128xbf16>
    %12 = arith.truncf %9 : vector<8x128xf32> to vector<8x128xbf16>
    %13 = tpu.concatenate %11, %12 in 1 : vector<8x128xbf16>, vector<8x128xbf16> -> vector<8x256xbf16>
    %c0_6 = arith.constant 0 : index
    %c0_7 = arith.constant 0 : index
    %14 = vector.load %arg4[%c0_6, %c0_7] : memref<256x128xbf16, #tpu.memory_space<vmem>>, vector<256x128xbf16>
    %cst_8 = arith.constant dense<0.000000e+00> : vector<8x128xf32>
    %15 = tpu.matmul %13, %14, %cst_8 {dimension_numbers = #tpu.dot_dimension_numbers<[1], [0], [0], [1], [0, 0, 1, 1], [], []>} : vector<8x256xbf16>, vector<256x128xbf16>, vector<8x128xf32> -> vector<8x128xf32>
    %c0_9 = arith.constant 0 : index
    %c0_10 = arith.constant 0 : index
    %16 = vector.load %arg5[%c0_9, %c0_10] : memref<1x128xf32, #tpu.memory_space<vmem>>, vector<1x128xf32>
    %17 = vector.broadcast %16 : vector<1x128xf32> to vector<8x128xf32>
    %18 = arith.addf %15, %17 : vector<8x128xf32>
    %19 = tpu.iota {dimensions = array<i32: 1>} : vector<8x128xi32>
    %c8_i32_11 = arith.constant 8 : i32
    %20 = vector.broadcast %c8_i32_11 : i32 to vector<8x128xi32>
    %21 = arith.cmpi slt, %19, %20 : vector<8x128xi32>
    %cst_12 = arith.constant 0xFF800000 : f32
    %22 = vector.broadcast %cst_12 : f32 to vector<8x128xf32>
    %23 = arith.select %21, %18, %22 : vector<8x128xi1>, vector<8x128xf32>
    %cst_13 = arith.constant dense<0xFF800000> : vector<8xf32>
    %24 = vector.multi_reduction <maximumf>, %23, %cst_13 [1] : vector<8x128xf32> to vector<8xf32>
    %25 = vector.shape_cast %24 : vector<8xf32> to vector<8x1xf32>
    %26 = vector.broadcast %25 : vector<8x1xf32> to vector<8x128xf32>
    %27 = arith.subf %23, %26 : vector<8x128xf32>
    %28 = math.exp %27 : vector<8x128xf32>
    %cst_14 = arith.constant dense<0.000000e+00> : vector<8xf32>
    %29 = vector.multi_reduction <add>, %28, %cst_14 [1] : vector<8x128xf32> to vector<8xf32>
    %30 = vector.shape_cast %29 : vector<8xf32> to vector<8x1xf32>
    %31 = math.log %30 : vector<8x1xf32>
    %32 = vector.broadcast %25 : vector<8x1xf32> to vector<8x128xf32>
    %33 = arith.subf %18, %32 : vector<8x128xf32>
    %34 = vector.broadcast %31 : vector<8x1xf32> to vector<8x128xf32>
    %35 = arith.subf %33, %34 : vector<8x128xf32>
    %cst_15 = arith.constant 0.000000e+00 : f32
    %36 = vector.broadcast %cst_15 : f32 to vector<8x128xf32>
    %37 = arith.select %21, %35, %36 : vector<8x128xi1>, vector<8x128xf32>
    %c0_16 = arith.constant 0 : index
    %c0_17 = arith.constant 0 : index
    %38 = vector.load %arg6[%c0_16, %c0_17] : memref<8x128xf32, #tpu.memory_space<vmem>>, vector<8x128xf32>
    tpu.vector_store %arg6[%c0_16, %c0_17], %37 {strides = array<i32>} : memref<8x128xf32, #tpu.memory_space<vmem>>, vector<8x128xf32>,
    return
  }
  func.func @transform_0(%arg0: i32) -> (i32, i32) {
    %c0_i32 = arith.constant 0 : i32
    %c0_i32_0 = arith.constant 0 : i32
    %c0_i32_1 = arith.constant 0 : i32
    return %c0_i32, %c0_i32_0 : i32, i32
  }
  func.func @transform_1(%arg0: i32) -> (i32, i32) {
    %c0_i32 = arith.constant 0 : i32
    %c0_i32_0 = arith.constant 0 : i32
    return %arg0, %c0_i32 : i32, i32
  }
  func.func @transform_2(%arg0: i32) -> (i32, i32) {
    %c0_i32 = arith.constant 0 : i32
    %c0_i32_0 = arith.constant 0 : i32
    return %arg0, %c0_i32 : i32, i32
  }
  func.func @transform_3(%arg0: i32) -> (i32, i32) {
    %c0_i32 = arith.constant 0 : i32
    %c0_i32_0 = arith.constant 0 : i32
    %c0_i32_1 = arith.constant 0 : i32
    return %c0_i32, %c0_i32_0 : i32, i32
  }
  func.func @transform_4(%arg0: i32) -> (i32, i32) {
    %c0_i32 = arith.constant 0 : i32
    %c0_i32_0 = arith.constant 0 : i32
    %c0_i32_1 = arith.constant 0 : i32
    return %c0_i32, %c0_i32_0 : i32, i32
  }
  func.func @transform_5(%arg0: i32) -> (i32, i32) {
    %c0_i32 = arith.constant 0 : i32
    %c0_i32_0 = arith.constant 0 : i32
    return %arg0, %c0_i32 : i32, i32
  }
}

</mosaic_0001>

<bundles_post_ra>
// kernel: cheb_forward_prepared.3
= control target key start
LH: loop header
LB: loop body
LE: loop exit
PB: predicated region body
PF: predicated region fallthrough
CT: control target
= control target key end

     0   :  { %vm30_vm0 = vcmask 1043456   ;;  %vm26_vm1 = vcmask 64512   ;;  %v392_v1 = vmov 0.0   ;;  %vm393_vm2 = vmmov 0   ;;  %s504_s0 = inlined_call_operand.vmem [shape: bf16[8,128], index: 0, kind: input, shape index: {}]   ;;  %s505_s1 = inlined_call_operand.vmem [shape: s8[8,8], index: 1, kind: input, shape index: {}]   ;;  %s506_s2 = inlined_call_operand.vmem [shape: f32[8,1], index: 2, kind: input, shape index: {}]   ;;  %s507_s3 = inlined_call_operand.vmem [shape: bf16[256,128], index: 3, kind: input, shape index: {}]   ;;  %s508_s4 = inlined_call_operand.vmem [shape: f32[1,128], index: 4, kind: input, shape index: {}]   ;;  %s509_s5 = inlined_call_operand.hbm [shape: f32[8,128], index: 5, kind: output, shape index: {}]  }
   0x1   :  { %v25_v0 = vld [vmem:[%s504_s0] sm:$0xf]  ;;  %337 = vmatprep.subr.bf16.mxu0 %v392_v1  ;;  %339 = vmatprep.mubr.msk.bf16.mxu0 %vm393_vm2, %v392_v1  ;;  %v394_v7 = vmov 0   ;;  %v350_v9 = vld [vmem:[%s507_s3 + $0x48] sm:$0xff]   ;;  %v352_v11 = vld [vmem:[%s507_s3 + $0x50] sm:$0xff]  }
   0x2   :  { %v32_v2 = vsel %vm30_vm0, %v25_v0, 0  ;;  %v23_v3 = vld [vmem:[%s505_s1] sm:$0x3]  ;;  %347 = vset.pattern.permute.xlu0 %v394_v7  ;;  %v351_v10 = vld [vmem:[%s507_s3 + $0x8] sm:$0xff]   ;;  %v353_v12 = vld [vmem:[%s507_s3 + $0x10] sm:$0xff]  }
   0x3   :  { %v74_v4 = vld [vmem:[%s506_s2] sm:$0xff]  ;;  %338 = vmatpush3.bf16.msra.mxu0 %v32_v2  ;;  %v24_v6 = vunpack.c.l.s8.bf16 %v23_v3  ;;  %v354_v13 = vld [vmem:[%s507_s3 + $0x58] sm:$0xff]  }
   0x4   :  { %v348_v5 = vld [vmem:[%s507_s3 + $0x40] sm:$0xff]   ;;  %77 = vperm.xlu0 %347, %v74_v4   ;;  %v355_v14 = vld [vmem:[%s507_s3 + $0x18] sm:$0xff]  }
   0x5   :  { %315 = vmatprep.subr.bf16.mxu1 %v348_v5  ;;  %v349_v8 = vld [vmem:[%s507_s3] sm:$0xff]  }
   0x6   :  { %340 = vmatmul.mubr.msk.bf16.vlgmr.msra.gmra.mrb[0].mxu0 %vm26_vm1, %v24_v6  ;;  %316 = vmatpush3.bf16.msra.mxu1 %v349_v8  ;;  %v356_v15 = vld [vmem:[%s507_s3 + $0x60] sm:$0xff]  }
   0x7   :  { %317 = vmatprep.subr.bf16.mxu1 %v350_v9  ;;  %v357_v16 = vld [vmem:[%s507_s3 + $0x20] sm:$0xff]  }
   0xa   :  { %318 = vmatpush3.bf16.msra.mxu1 %v351_v10 }
   0xb   :  { %319 = vmatprep.subr.bf16.mxu1 %v352_v11 }
   0xe   :  { %320 = vmatpush3.bf16.msra.mxu1 %v353_v12 }
   0xf   :  { %321 = vmatprep.subr.bf16.mxu1 %v354_v13 }
  0x12   :  { %322 = vmatpush3.bf16.msra.mxu1 %v355_v14 }
  0x13   :  { %10 = vsyncpa [#allocation3], 0  ;;  %323 = vmatprep.subr.bf16.mxu1 %v356_v15  ;;  %v358_v17 = vld [vmem:[%s507_s3 + $0x68] sm:$0xff]   ;;  %v360_v19 = vld [vmem:[%s507_s3 + $0x70] sm:$0xff]   ;;  %v262_v31 = vlaneseq }
  0x14   :  { %v359_v18 = vld [vmem:[%s507_s3 + $0x28] sm:$0xff]   ;;  %v361_v20 = vld [vmem:[%s507_s3 + $0x30] sm:$0xff]   ;;  %v362_v21 = vld [vmem:[%s507_s3 + $0x78] sm:$0xff]  }
  0x15   :  { %v363_v22 = vld [vmem:[%s507_s3 + $0x38] sm:$0xff]   ;;  %v85_v30 = vld [vmem:[%s504_s0] sm:$0xf]  ;;  %v263_v32 = vand.u32 127, %v262_v31  ;;  %s395_s0 = smov [#allocation2]  }
  0x16   :  { %324 = vmatpush3.bf16.msra.mxu1 %v357_v16  ;;  %v296_v35 = vld [vmem:[%s508_s4] ss:$0 sm:$0xff]  ;;  %s285_s4 = sshll.u32 %s395_s0, 4  ;;  %s286_s4 = int_to_ptr.vmem [resolvable:$true] %s285_s4 }
  0x17   :  { %325 = vmatprep.subr.bf16.mxu1 %v358_v17  ;;  %vm264_vm3 = vcmp.lt.s32.totalorder %v263_v32, 8  ;;  %s368_s30 = scalar_lea.vmem %s286_s4, 128  ;;  %p373_p1 = scmp.lt.s32.totalorder %s286_s4, %s286_s4 }
  0x18   :  { %p369_p0 = scmp.ne.s32.totalorder %s286_s4, %s368_s30  ;;  %p374_p2 = scmp.lt.s32.totalorder %s368_s30, %s368_s30 }
  0x1a   :  { %326 = vmatpush3.bf16.msra.mxu1 %v359_v18  ;;  %p375_p3 = por %p374_p2, %p373_p1 }
  0x1b   :  { %327 = vmatprep.subr.bf16.mxu1 %v360_v19 }
  0x1c   :  { %p376_p4 = pnand %p375_p3, %p369_p0 }
  0x1e   :  { %328 = vmatpush3.bf16.msra.mxu1 %v361_v20 }
  0x1f   :  { %329 = vmatprep.subr.bf16.mxu1 %v362_v21 }
  0x22   :  { %330 = vmatpush3.bf16.msra.mxu1 %v363_v22 }
  0x83   :  { %v78_v23 = vpop.permute.xlu0 %77 }
  0xd9   :  { %v68_v24 = vpop.f32.mrb[0].mxu0 }
  0xda   :  { %v341_v25 = vpop.f32.mrb[1].mxu0  ;;  %v80_v26 = vmul.f32 %v78_v23, %v68_v24 }
  0xdb   :  { %v71_v27 = vpop.f32.mrb[2].mxu0 }
  0xdc   :  { %v342_v28 = vpop.f32.mrb[3].mxu0  ;;  %v86_v29 = vpack.c.bf16 %v80_v26, %v80_v26 }
  0xde   :  { %254 = vmatprep.mubr.bf16.mxu1 %v86_v29 }
  0xdf   :  { %255 = vmatmul.mubr.bf16.vlgmr.msra.gmra.mrb[0].mxu1 %v85_v30 }
 0x1b2   :  { %v331_v33 = vpop.f32.mrb[0].mxu1 }
 0x1b3   :  { %v332_v34 = vpop.f32.mrb[1].mxu1 }
 0x1b4   :  { %v333_v36 = vadd.f32 %v332_v34, %v331_v33  ;;  %v334_v37 = vpop.f32.mrb[2].mxu1 }
 0x1b5   :  { %v335_v38 = vpop.f32.mrb[3].mxu1 }
 0x1b6   :  { %v257_v39 = vadd.f32 %v333_v36, %v296_v35 }
 0x1b8   :  { %v265_v40 = vsel %vm264_vm3, %v257_v39, -inf }
 0x1b9   :  { %266 = vmax.xlane.f32.xlu0 %v265_v40 }
 0x246   :  { %v267_v41 = vpop.xlane.xlu0 %266 }
 0x247   :  { %v268_v42 = vsub.f32 %v265_v40, %v267_v41  ;;  %v275_v47 = vsub.f32 %v257_v39, %v267_v41 }
 0x249   :  { %v269_v43 = vmul.f32 1.442695, %v268_v42 }
 0x24b   :  { %364 = vpow2.f32 %v269_v43 }
 0x255   :  { %v365_v44 = vpop.eup %364 }
 0x256   :  { %271 = vadd.xlane.f32.xlu1 %v365_v44 }
 0x2e3   :  { %v272_v45 = vpop.xlane.xlu1 %271 }
 0x2e4   :  { %366 = vlog2.f32 %v272_v45 }
 0x2ee   :  { %v367_v46 = vpop.eup %366 }
 0x2ef   :  { %v274_v48 = vmul.f32 0.6931472, %v367_v46 }
 0x2f1   :  { %v276_v49 = vsub.f32 %v275_v47, %v274_v48 }
 0x2f3   :  { %v277_v50 = vsel %vm264_vm3, %v276_v49, 0.0 }
 0x2f4   :  { %278 = vst [vmem:[#allocation2] sm:$0xff] %v277_v50 }
 0x2f5   :  { %379 = shalt.err (!%p376_p4)
}
 0x2f6   :  { %s380_s8 = scalar_lea.hbm %s509_s5, 128 }
 0x2f7   :  { %p381_p5 = scmp.ne.s32.totalorder %s509_s5, %s380_s8  ;;  %p384_p6 = scmp.lt.u32.totalorder %s380_s8, %s509_s5 }
 0x2f9   :  { %p386_p7 = pnand %p384_p6, %p381_p5 }
 0x2fb   :  { %389 = shalt.err (!%p386_p7)
}
 0x2fc   :  { %288 = dma.vmem_to_hbm [thread:$0]  %s286_s4, 128, %s509_s5, [#allocation3]  }
 0x2fd   :  { %390 = dma.done.wait [#allocation3], 128  }
 0x2fe   :  { %391 = vsyncadd [#allocation3], 4294967168 }
 0x2ff   :  { %292 = vsyncpa [#allocation3], 1 }

// kernel: cheb_forward_prepared.2
= control target key start
LH: loop header
LB: loop body
LE: loop exit
PB: predicated region body
PF: predicated region fallthrough
CT: control target
= control target key end

     0   :  { %10 = vsyncpa [#allocation3], 0  ;;  %s535_s0 = inlined_call_operand.hbm [shape: bf16[8,128], index: 0, kind: input, shape index: {}]   ;;  %s536_s1 = inlined_call_operand.vmem [shape: s8[8,8], index: 1, kind: input, shape index: {}]   ;;  %s537_s2 = inlined_call_operand.vmem [shape: f32[8,1], index: 2, kind: input, shape index: {}]   ;;  %s538_s3 = inlined_call_operand.hbm [shape: bf16[256,128], index: 3, kind: input, shape index: {}]   ;;  %s539_s4 = inlined_call_operand.hbm [shape: f32[1,128], index: 4, kind: input, shape index: {}]   ;;  %s540_s5 = inlined_call_operand.vmem [shape: bf16[8,128], index: 5, kind: output, shape index: {}]  }
   0x1   :  { %11 = vsyncpa [#allocation5], 0  ;;  %s452_s18 = smov [#allocation4]   ;;  %s382_s22 = scalar_lea.hbm %s538_s3, 2048 }
   0x2   :  { %s31_s19 = sshll.u32 %s452_s18, 4  ;;  %p383_p0 = scmp.ne.s32.totalorder %s538_s3, %s382_s22  ;;  %s32_s19 = int_to_ptr.vmem [resolvable:$true] %s31_s19 }
   0x3   :  { %p386_p1 = scmp.lt.u32.totalorder %s382_s22, %s538_s3 }
   0x5   :  { %p388_p2 = pnand %p386_p1, %p383_p0 }
   0x7   :  { %391 = shalt.err (!%p388_p2)
}
   0x8   :  { %s392_s27 = scalar_lea.vmem %s32_s19, 2048  ;;  %p397_p4 = scmp.lt.s32.totalorder %s32_s19, %s32_s19 }
   0x9   :  { %p393_p3 = scmp.ne.s32.totalorder %s32_s19, %s392_s27  ;;  %p398_p5 = scmp.lt.s32.totalorder %s392_s27, %s392_s27 }
   0xb   :  { %p399_p6 = por %p398_p5, %p397_p4 }
   0xd   :  { %p400_p7 = pnand %p399_p6, %p393_p3 }
   0xf   :  { %403 = shalt.err (!%p400_p7)
}
  0x10   :  { %s453_s28 = smov 64   ;;  %s454_s29 = smov 4  }
  0x11   :  { %37 = dma.hbm_to_vmem [thread:$0]  %s538_s3, 2048, %s32_s19, [#allocation5], %s453_s28, %s453_s28, %s454_s29  }
  0x12   :  { %s455_s7 = smov [#allocation2]   ;;  %s456_s9 = smov [#allocation6]  }
  0x13   :  { %s18_s8 = sshll.u32 %s455_s7, 4  ;;  %s44_s10 = sshll.u32 %s456_s9, 4  ;;  %s19_s8 = int_to_ptr.vmem [resolvable:$true] %s18_s8  ;;  %s45_s10 = int_to_ptr.vmem [resolvable:$true] %s44_s10 }
  0x14   :  { %s404_s13 = scalar_lea.hbm %s535_s0, 64 }
  0x15   :  { %p405_p8 = scmp.ne.s32.totalorder %s535_s0, %s404_s13  ;;  %p408_p9 = scmp.lt.u32.totalorder %s404_s13, %s535_s0 }
  0x17   :  { %p410_p10 = pnand %p408_p9, %p405_p8 }
  0x19   :  { %413 = shalt.err (!%p410_p10)
}
  0x1a   :  { %s414_s3 = scalar_lea.vmem %s19_s8, 64  ;;  %p419_p12 = scmp.lt.s32.totalorder %s19_s8, %s19_s8 }
  0x1b   :  { %p415_p11 = scmp.ne.s32.totalorder %s19_s8, %s414_s3  ;;  %p420_p13 = scmp.lt.s32.totalorder %s414_s3, %s414_s3 }
  0x1d   :  { %p421_p0 = por %p420_p13, %p419_p12 }
  0x1f   :  { %p422_p1 = pnand %p421_p0, %p415_p11 }
  0x21   :  { %425 = shalt.err (!%p422_p1)
}
  0x22   :  { %21 = dma.hbm_to_vmem [thread:$0]  %s535_s0, 64, %s19_s8, [#allocation3]  }
  0x23   :  { %s426_s22 = scalar_lea.hbm %s539_s4, 16 }
  0x24   :  { %p427_p2 = scmp.ne.s32.totalorder %s539_s4, %s426_s22  ;;  %p430_p3 = scmp.lt.u32.totalorder %s426_s22, %s539_s4 }
  0x26   :  { %p432_p4 = pnand %p430_p3, %p427_p2 }
  0x28   :  { %435 = shalt.err (!%p432_p4)
}
  0x29   :  { %s436_s27 = scalar_lea.vmem %s45_s10, 16  ;;  %s440_s28 = scalar_lea.vmem %s45_s10, 32 }
  0x2a   :  { %p437_p5 = scmp.ne.s32.totalorder %s45_s10, %s436_s27  ;;  %p441_p6 = scmp.lt.s32.totalorder %s45_s10, %s45_s10 }
  0x2b   :  { %p442_p7 = scmp.lt.s32.totalorder %s440_s28, %s436_s27 }
  0x2d   :  { %p443_p8 = por %p442_p7, %p441_p6 }
  0x2f   :  { %p444_p9 = pnand %p443_p8, %p437_p5 }
  0x31   :  { %447 = shalt.err (!%p444_p9)
}
  0x32   :  { %47 = dma.hbm_to_vmem [thread:$0]  %s539_s4, 16, %s45_s10, [#allocation5]  }
  0x33   :  { %448 = dma.done.wait [#allocation3], 64  }
  0x34   :  { %449 = vsyncadd [#allocation3], 4294967232 }
  0x35   :  { %450 = dma.done.wait [#allocation5], 2064  }
  0x36   :  { %451 = vsyncadd [#allocation5], 4294965232  ;;  %v457_v0 = vmov 0.0   ;;  %vm458_vm0 = vmmov 0   ;;  %v459_v1 = vmov 0   ;;  %vm66_vm1 = vcmask 1043456  }
  0x37   :  { %351 = vmatprep.subr.bf16.mxu0 %v457_v0  ;;  %353 = vmatprep.mubr.msk.bf16.mxu0 %vm458_vm0, %v457_v0  ;;  %v61_v2 = vld [vmem:[#allocation2] sm:$0xf]  ;;  %v366_v7 = vld [vmem:[#allocation4 + $0x40] sm:$0xff]   ;;  %vm62_vm2 = vcmask 64512   ;;  %v368_v9 = vld [vmem:[#allocation4 + $0x48] sm:$0xff]  }
  0x38   :  { %365 = vset.pattern.permute.xlu0 %v459_v1  ;;  %v59_v3 = vld [vmem:[%s536_s1] sm:$0x3]  ;;  %v68_v5 = vsel %vm66_vm1, %v61_v2, 0  ;;  %v367_v8 = vld [vmem:[#allocation4] sm:$0xff]   ;;  %329 = vmatprep.subr.bf16.mxu1 %v366_v7  ;;  %v369_v10 = vld [vmem:[#allocation4 + $0x8] sm:$0xff]  }
  0x39   :  { %v110_v4 = vld [vmem:[%s537_s2] sm:$0xff]  ;;  %v60_v6 = vunpack.c.l.s8.bf16 %v59_v3  ;;  %352 = vmatpush3.bf16.msra.mxu0 %v68_v5  ;;  %330 = vmatpush3.bf16.msra.mxu1 %v367_v8  ;;  %v370_v11 = vld [vmem:[#allocation4 + $0x50] sm:$0xff]   ;;  %v376_v17 = vld [vmem:[#allocation4 + $0x68] sm:$0xff]  }
  0x3a   :  { %113 = vperm.xlu0 %365, %v110_v4   ;;  %331 = vmatprep.subr.bf16.mxu1 %v368_v9  ;;  %v371_v12 = vld [vmem:[#allocation4 + $0x10] sm:$0xff]   ;;  %v372_v13 = vld [vmem:[#allocation4 + $0x58] sm:$0xff]   ;;  %v374_v15 = vld [vmem:[#allocation4 + $0x60] sm:$0xff]  }
  0x3b   :  { %v373_v14 = vld [vmem:[#allocation4 + $0x18] sm:$0xff]   ;;  %v375_v16 = vld [vmem:[#allocation4 + $0x20] sm:$0xff]   ;;  %v377_v18 = vld [vmem:[#allocation4 + $0x28] sm:$0xff]  }
  0x3c   :  { %354 = vmatmul.mubr.msk.bf16.vlgmr.msra.gmra.mrb[0].mxu0 %vm62_vm2, %v60_v6  ;;  %v378_v19 = vld [vmem:[#allocation4 + $0x70] sm:$0xff]   ;;  %v380_v21 = vld [vmem:[#allocation4 + $0x78] sm:$0xff]   ;;  %v310_v32 = vld [vmem:[#allocation6] ss:$0 sm:$0xff] }
  0x3d   :  { %332 = vmatpush3.bf16.msra.mxu1 %v369_v10  ;;  %v379_v20 = vld [vmem:[#allocation4 + $0x30] sm:$0xff]   ;;  %v381_v22 = vld [vmem:[#allocation4 + $0x38] sm:$0xff]  }
  0x3e   :  { %333 = vmatprep.subr.bf16.mxu1 %v370_v11  ;;  %v121_v30 = vld [vmem:[#allocation2] sm:$0xf] }
  0x41   :  { %334 = vmatpush3.bf16.msra.mxu1 %v371_v12 }
  0x42   :  { %335 = vmatprep.subr.bf16.mxu1 %v372_v13 }
  0x45   :  { %336 = vmatpush3.bf16.msra.mxu1 %v373_v14 }
  0x46   :  { %337 = vmatprep.subr.bf16.mxu1 %v374_v15 }
  0x49   :  { %338 = vmatpush3.bf16.msra.mxu1 %v375_v16 }
  0x4a   :  { %339 = vmatprep.subr.bf16.mxu1 %v376_v17 }
  0x4d   :  { %340 = vmatpush3.bf16.msra.mxu1 %v377_v18 }
  0x4e   :  { %341 = vmatprep.subr.bf16.mxu1 %v378_v19 }
  0x51   :  { %342 = vmatpush3.bf16.msra.mxu1 %v379_v20 }
  0x52   :  { %343 = vmatprep.subr.bf16.mxu1 %v380_v21 }
  0x55   :  { %344 = vmatpush3.bf16.msra.mxu1 %v381_v22 }
  0xb9   :  { %v114_v23 = vpop.permute.xlu0 %113 }
 0x10f   :  { %v104_v24 = vpop.f32.mrb[0].mxu0 }
 0x110   :  { %v355_v25 = vpop.f32.mrb[1].mxu0  ;;  %v116_v26 = vmul.f32 %v114_v23, %v104_v24 }
 0x111   :  { %v107_v27 = vpop.f32.mrb[2].mxu0 }
 0x112   :  { %v356_v28 = vpop.f32.mrb[3].mxu0  ;;  %v122_v29 = vpack.c.bf16 %v116_v26, %v116_v26 }
 0x114   :  { %290 = vmatprep.mubr.bf16.mxu1 %v122_v29 }
 0x115   :  { %291 = vmatmul.mubr.bf16.vlgmr.msra.gmra.mrb[0].mxu1 %v121_v30 }
 0x1e8   :  { %v345_v31 = vpop.f32.mrb[0].mxu1 }
 0x1e9   :  { %v346_v33 = vpop.f32.mrb[1].mxu1 }
 0x1ea   :  { %v347_v34 = vadd.f32 %v346_v33, %v345_v31  ;;  %v348_v35 = vpop.f32.mrb[2].mxu1 }
 0x1eb   :  { %v349_v36 = vpop.f32.mrb[3].mxu1 }
 0x1ec   :  { %v293_v37 = vadd.f32 %v347_v34, %v310_v32 }
 0x1ee   :  { %v298_v38 = vmax.f32 %v293_v37, 0.0 }
 0x1f0   :  { %v299_v39 = vpack.c.bf16 %v298_v38, %v298_v38 }
 0x1f2   :  { %300 = vst [vmem:[%s540_s5] sm:$0xf] %v299_v39 }
 0x1f3   :  { %305 = vsyncpa [#allocation3], 1 }
 0x1f4   :  { %306 = vsyncpa [#allocation5], 1 }

</bundles_post_ra>
